<compile_context>
chip_gen: v6e
topology: v6e:2x2x1
jax: 0.10.0
libtpu: 0.0.40
codegen_flags: <defaults>
</compile_context>

<pallas_src>
import jax
import jax.numpy as jnp
from jax.experimental import pallas as pl
from jax.experimental.pallas import tpu as pltpu


def _round_up(x, m):
    return ((x + m - 1) // m) * m


# ---------------------------------------------------------------------------
# Small-shape fast path: one fused kernel, whole problem in VMEM, exact math.
# ---------------------------------------------------------------------------
def _fused_small_kernel(x_ref, proj_ref, out_ref):
    # x_ref: (1, S, D); proj_ref: (D, R); out_ref: (1, S, S)
    t = jnp.dot(x_ref[0], proj_ref[...], preferred_element_type=jnp.float32)
    diffs = t[:, None, :] - t[None, :, :]          # (S, S, R)
    out_ref[0] = jnp.sum(diffs * diffs, axis=-1).astype(out_ref.dtype)


def _small_fused(batch, proj):
    B, S, D = batch.shape
    _, R = proj.shape
    return pl.pallas_call(
        _fused_small_kernel,
        out_shape=jax.ShapeDtypeStruct((B, S, S), jnp.float32),
        grid_spec=pltpu.PrefetchScalarGridSpec(
            num_scalar_prefetch=0,
            grid=(B,),
            in_specs=[
                pl.BlockSpec((1, S, D), lambda b: (b, 0, 0)),
                pl.BlockSpec((D, R), lambda b: (0, 0)),
            ],
            out_specs=pl.BlockSpec((1, S, S), lambda b: (b, 0, 0)),
        ),
        compiler_params=pltpu.CompilerParams(
            dimension_semantics=("parallel",)
        ),
    )(batch, proj)


# ---------------------------------------------------------------------------
# Tiled path: pass 1 (projection + norms, once), pass 2 (Gram-trick distances).
# ---------------------------------------------------------------------------
def _project_kernel(x_ref, proj_ref, t_ref, ncol_ref, nrow_ref):
    # x_ref: (1, TILE, D), proj_ref: (D, R), t_ref: (1, TILE, R)
    # ncol_ref: (1, TILE, 1) -> ||t_i||^2 as a column (i side)
    # nrow_ref: (1, 1, TILE) -> ||t_j||^2 as a row    (j side)
    t = jnp.dot(x_ref[0], proj_ref[...], preferred_element_type=jnp.float32)
    t_ref[0] = t
    t2 = t * t
    ncol_ref[0] = jnp.sum(t2, axis=-1, keepdims=True)
    # Row layout via a ones-row matmul: avoids a sublane->lane transpose, and
    # doing it once here removes all norm work from the (i, j) tile loop.
    ones_row = jnp.ones((1, t2.shape[-1]), dtype=jnp.float32)
    nrow_ref[0] = jax.lax.dot_general(
        ones_row, t2, (((1,), (1,)), ((), ())),
        preferred_element_type=jnp.float32,
    )


def _dist_kernel(ti_ref, tj_ref, ni_ref, nj_ref, out_ref):
    # ti/tj: (1, TILE, R); ni: (1, TILE, 1); nj: (1, 1, TILE); out: (1, T, T)
    g = jax.lax.dot_general(
        ti_ref[0], tj_ref[0], (((1,), (1,)), ((), ())),
        preferred_element_type=jnp.float32,
    )                                              # Gram block <t_i, t_j>
    d = ni_ref[0] + nj_ref[0] - 2.0 * g
    # Gram-form cancellation can yield tiny negatives on (near-)identical rows.
    out_ref[0] = jnp.maximum(d, 0.0).astype(out_ref.dtype)


def _pick_tile(S, r_eff):
    """Largest lane-dense output tile that (a) fits VMEM double-buffered and
    (b) preferably divides S exactly (no padding -> no post-kernel slice)."""
    def fits(t):
        # 2 buffers x 4 bytes x (out tile + two t tiles); norms negligible.
        return 8 * (t * t + 2 * t * r_eff) <= 24 * 1024 * 1024

    candidates = [t for t in (512, 256, 128) if fits(t)] or [128]
    for t in candidates:
        if S % t == 0:
            return t
    # Padding unavoidable: trade the fixed ~0.35us/grid-step overhead against
    # padded write traffic + the post-kernel slice copy (~2x output bytes).
    best_t, best_cost = None, None
    for t in candidates:
        sp = _round_up(S, t)
        steps = (sp // t) ** 2
        cost = steps * 350.0 + 8.0 * sp * sp / 1300.0   # rough ns model
        if best_cost is None or cost < best_cost:
            best_t, best_cost = t, cost
    return best_t


def _tiled(batch, proj, tile=None):
    B, S, D = batch.shape
    _, R = proj.shape

    # Rank axis: keep UNPADDED when R < 128 (full-last-dim blocks are legal and
    # contiguous DMAs); only round up to a lane multiple for large ranks.
    R_eff = R if R < 128 else _round_up(R, 128)
    if tile is None:
        tile = _pick_tile(S, R_eff)
    S_pad = _round_up(S, tile)
    n_s = S_pad // tile

    x = batch
    if S_pad != S:
        x = jnp.pad(x, ((0, 0), (0, S_pad - S), (0, 0)))
    p = proj
    if R_eff != R:
        p = jnp.pad(p, ((0, 0), (0, R_eff - R)))

    # --- Pass 1: projection + row norms, done once per sentence tile. ---
    # (For very small D it could be fused into pass 2 to skip the t round-trip;
    #  tiny-D configs are already served by the fused small-shape path.)
    t, ncol, nrow = pl.pallas_call(
        _project_kernel,
        out_shape=(
            jax.ShapeDtypeStruct((B, S_pad, R_eff), jnp.float32),
            jax.ShapeDtypeStruct((B, S_pad, 1), jnp.float32),
            jax.ShapeDtypeStruct((B, 1, S_pad), jnp.float32),
        ),
        grid_spec=pltpu.PrefetchScalarGridSpec(
            num_scalar_prefetch=0,
            grid=(B, n_s),
            in_specs=[
                pl.BlockSpec((1, tile, D), lambda b, i: (b, i, 0)),
                pl.BlockSpec((D, R_eff), lambda b, i: (0, 0)),  # constant weight
            ],
            out_specs=[
                pl.BlockSpec((1, tile, R_eff), lambda b, i: (b, i, 0)),
                pl.BlockSpec((1, tile, 1), lambda b, i: (b, i, 0)),
                pl.BlockSpec((1, 1, tile), lambda b, i: (b, 0, i)),
            ],
        ),
        compiler_params=pltpu.CompilerParams(
            dimension_semantics=("parallel", "parallel")
        ),
    )(x, p)

    # --- Pass 2: pairwise squared distances, tiled over (b, i, j). ---
    # i-side blocks are j-invariant (j is the innermost axis), so they are not
    # re-DMA'd along j; the epilogue is ni + nj - 2g (no per-step norm work).
    out = pl.pallas_call(
        _dist_kernel,
        out_shape=jax.ShapeDtypeStruct((B, S_pad, S_pad), jnp.float32),
        grid_spec=pltpu.PrefetchScalarGridSpec(
            num_scalar_prefetch=0,
            grid=(B, n_s, n_s),
            in_specs=[
                pl.BlockSpec((1, tile, R_eff), lambda b, i, j: (b, i, 0)),
                pl.BlockSpec((1, tile, R_eff), lambda b, i, j: (b, j, 0)),
                pl.BlockSpec((1, tile, 1), lambda b, i, j: (b, i, 0)),
                pl.BlockSpec((1, 1, tile), lambda b, i, j: (b, 0, j)),
            ],
            out_specs=pl.BlockSpec((1, tile, tile), lambda b, i, j: (b, i, j)),
        ),
        compiler_params=pltpu.CompilerParams(
            dimension_semantics=("parallel", "parallel", "parallel")
        ),
    )(t, t, ncol, nrow)

    if S_pad != S:
        out = out[:, :S, :S]
    return out


def two_word_psd_probe(batch, proj, *, tile=None):
    """batch: (B, S, D) f32, proj: (D, R) f32 -> (B, S, S) f32 sq. distances."""
    B, S, D = batch.shape
    D2, R = proj.shape
    assert D == D2
    # Fast path: whole per-sentence problem (incl. the (S, S, R) diff
    # intermediate of the exact formulation) comfortably fits in VMEM.
    if (tile is None and S <= 128
            and S * S * R * 4 <= (1 << 20)
            and D * R * 4 <= (8 << 20)):
        return _small_fused(batch, proj)
    return _tiled(batch, proj, tile=tile)


def reference(batch, proj):
    t = jnp.matmul(batch, proj)                       # (B, S, R)
    diffs = t[:, :, None, :] - t[:, None, :, :]       # (B, S, S, R)
    return jnp.sum(diffs ** 2, axis=-1)               # (B, S, S)


if __name__ == "__main__":
    # Shapes consistent with the module: hidden_dim D = 32, probe_rank R = 16,
    # batch B = 2, seq S = 8  (takes the fused small-shape path).
    B, S, D, R = 2, 8, 32, 16
    key = jax.random.PRNGKey(0)
    k_x, k_p = jax.random.split(key)
    batch = jax.random.normal(k_x, (B, S, D), dtype=jnp.float32)
    # nn.init.uniform_(proj, -0.05, 0.05) -- deterministic synthetic init.
    proj = jax.random.uniform(
        k_p, (D, R), dtype=jnp.float32, minval=-0.05, maxval=0.05
    )

    out = jax.block_until_ready(two_word_psd_probe(batch, proj))
    ref = reference(batch, proj)
    assert out.shape == (B, S, S)
    assert jnp.allclose(out, ref, atol=1e-5, rtol=1e-4)

    # Secondary check: exercise the tiled multi-block path (seq padding,
    # multi-tile grid, hoisted norms, post-kernel slice, unpadded small rank).
    B2, S2, D2, R2 = 2, 700, 48, 24
    kx2, kp2 = jax.random.split(jax.random.PRNGKey(1))
    batch2 = jax.random.normal(kx2, (B2, S2, D2), dtype=jnp.float32)
    proj2 = jax.random.uniform(
        kp2, (D2, R2), dtype=jnp.float32, minval=-0.05, maxval=0.05
    )
    out2 = jax.block_until_ready(two_word_psd_probe(batch2, proj2))
    ref2 = reference(batch2, proj2)
    assert out2.shape == (B2, S2, S2)
    assert jnp.allclose(out2, ref2, atol=1e-4, rtol=1e-4)

    print("KERNEL_OK")
</pallas_src>

<mosaic_0001>
module attributes {stable_mosaic.version = 11 : i64} {
  func.func @_fused_small_kernel(%arg0: i32, %arg1: memref<1x8x32xf32, #tpu.memory_space<vmem>>, %arg2: memref<32x16xf32, #tpu.memory_space<vmem>>, %arg3: memref<1x8x8xf32, #tpu.memory_space<vmem>>) attributes {dimension_semantics = [#tpu.dimension_semantics<parallel>], iteration_bounds = array<i64: 2>, scalar_prefetch = 0 : i64, scratch_operands = 0 : i64, tpu.core_type = #tpu.core_type<tc>, window_params = [{transform_indices = @transform_0, window_bounds = array<i64: 1, 8, 32>}, {pipeline_mode = #tpu.pipeline_mode<synchronous>, transform_indices = @transform_1, window_bounds = array<i64: 32, 16>}, {transform_indices = @transform_2, window_bounds = array<i64: 1, 8, 8>}]} {
    %c0 = arith.constant 0 : index
    %c0_0 = arith.constant 0 : index
    %c0_1 = arith.constant 0 : index
    %0 = vector.load %arg1[%c0, %c0_0, %c0_1] : memref<1x8x32xf32, #tpu.memory_space<vmem>>, vector<1x8x32xf32>
    %1 = vector.shape_cast %0 : vector<1x8x32xf32> to vector<8x32xf32>
    %c0_2 = arith.constant 0 : index
    %c0_3 = arith.constant 0 : index
    %2 = vector.load %arg2[%c0_2, %c0_3] : memref<32x16xf32, #tpu.memory_space<vmem>>, vector<32x16xf32>
    %cst = arith.constant dense<0.000000e+00> : vector<8x16xf32>
    %3 = tpu.matmul %1, %2, %cst {dimension_numbers = #tpu.dot_dimension_numbers<[1], [0], [0], [1], [0, 0, 1, 1], [], []>} : vector<8x32xf32>, vector<32x16xf32>, vector<8x16xf32> -> vector<8x16xf32>
    %4 = vector.shape_cast %3 : vector<8x16xf32> to vector<8x1x16xf32>
    %5 = vector.shape_cast %3 : vector<8x16xf32> to vector<1x8x16xf32>
    %6 = vector.broadcast %4 : vector<8x1x16xf32> to vector<8x8x16xf32>
    %7 = vector.broadcast %5 : vector<1x8x16xf32> to vector<8x8x16xf32>
    %8 = arith.subf %6, %7 : vector<8x8x16xf32>
    %9 = arith.mulf %8, %8 : vector<8x8x16xf32>
    %cst_4 = arith.constant dense<0.000000e+00> : vector<8x8xf32>
    %10 = vector.multi_reduction <add>, %9, %cst_4 [2] : vector<8x8x16xf32> to vector<8x8xf32>
    %c0_5 = arith.constant 0 : index
    %c0_6 = arith.constant 0 : index
    %c0_7 = arith.constant 0 : index
    %11 = vector.load %arg3[%c0_5, %c0_6, %c0_7] : memref<1x8x8xf32, #tpu.memory_space<vmem>>, vector<1x8x8xf32>
    %12 = vector.shape_cast %11 : vector<1x8x8xf32> to vector<8x8xf32>
    %13 = vector.shape_cast %10 : vector<8x8xf32> to vector<1x8x8xf32>
    tpu.vector_store %arg3[%c0_5, %c0_6, %c0_7], %13 {strides = array<i32>} : memref<1x8x8xf32, #tpu.memory_space<vmem>>, vector<1x8x8xf32>,
    return
  }
  func.func @transform_0(%arg0: i32) -> (i32, i32, i32) {
    %c0_i32 = arith.constant 0 : i32
    %c0_i32_0 = arith.constant 0 : i32
    %c0_i32_1 = arith.constant 0 : i32
    return %arg0, %c0_i32, %c0_i32_0 : i32, i32, i32
  }
  func.func @transform_1(%arg0: i32) -> (i32, i32) {
    %c0_i32 = arith.constant 0 : i32
    %c0_i32_0 = arith.constant 0 : i32
    %c0_i32_1 = arith.constant 0 : i32
    return %c0_i32, %c0_i32_0 : i32, i32
  }
  func.func @transform_2(%arg0: i32) -> (i32, i32, i32) {
    %c0_i32 = arith.constant 0 : i32
    %c0_i32_0 = arith.constant 0 : i32
    %c0_i32_1 = arith.constant 0 : i32
    return %arg0, %c0_i32, %c0_i32_0 : i32, i32, i32
  }
}

</mosaic_0001>

<bundles_post_ra>
// kernel: tpu_custom_call.1
= control target key start
LH: loop header
LB: loop body
LE: loop exit
PB: predicated region body
PF: predicated region fallthrough
CT: control target
= control target key end

     0   :  { %7 = vsyncpa [#allocation3], 0  ;;  %s758_s0 = inlined_call_operand.vmem [shape: f32[2,8,32], index: 0, kind: input, shape index: {}]   ;;  %s759_s1 = inlined_call_operand.vmem [shape: f32[32,16], index: 1, kind: input, shape index: {}]   ;;  %s760_s2 = inlined_call_operand.hbm [shape: f32[2,8,8], index: 2, kind: output, shape index: {}]  }
   0x1   :  { %9 = vsyncpa [#allocation3 + $0x1], 0  ;;  %s631_s9 = smov 0   ;;  %s633_s10 = smov 0  }
   0x2   :  { %s635_s11 = smov 0   ;;  %s637_s12 = smov 0  }
   0x3 LB: > { %s652_s13 = sadd.s32 4294967295, %s610_s12   ;;  %s481_s14 = sadd.s32 4294967294, %s610_s12   ;;  %s610_s12 = sphi %s637_s12, %s766_s12   ;;  %s606_s11 = sphi %s635_s11, %s765_s11   ;;  %s602_s10 = sphi %s633_s10, %s764_s10   ;;  %s598_s9 = sphi %s631_s9, %s763_s9  }
   0x4   : > { %s656_s15 = sadd.s32 1, %s610_s12   ;;  %s69_s16 = sadd.s32 1, %s606_s11 }
   0x5   : > { %s66_s17 = ssub.s32 %s610_s12, %s656_s15  ;;  %p79_p0 = scmp.ne.s32.totalorder %s606_s11, %s602_s10 }
   0x6   : > { %p67_p1 = scmp.eq.s32.totalorder %s66_s17, 0  ;;  %p80_p2 = scmp.eq.s32.totalorder %s652_s13, 1 }
   0x7   : > { %p85_p3 = scmp.ne.s32.totalorder %s602_s10, %s598_s9  ;;  %p86_p4 = scmp.eq.s32.totalorder %s481_s14, 1 }
   0x8   : > { %s667_s18 = scalar_select %p67_p1, %s606_s11, %s69_s16  }
   0x9   : > { %p669_p5 = por %p80_p2, %p79_p0  ;;  %p673_p6 = por %p86_p4, %p85_p3 }
   0xa   : > { %p484_p7 = scmp.ge.s32.totalorder %s610_s12, 1  ;;  %p114_p8 = scmp.lt.s32.totalorder %s610_s12, 3 }
   0xc   : > { %p115_p9 = pnand %p484_p7, %p114_p8 }
   0xd   : > { %p135_p10 = scmp.lt.s32.totalorder (!%p115_p9), %s652_s13, 1  ;;  %s132_s6 = sand.u32 (!%p115_p9), 1, %s602_s10  }
   0xe   : > { %118 = sbr.rel (%p115_p9) target bundleno = 400 (0x190), region = 28  ;;  %s485_s7 = sshll.u32 (!%p115_p9), %s132_s6, 3 }
   0xf   : > { %s489_s8 = sshll.u32 (!%p115_p9), %s652_s13, 7  ;;  %s134_s14 = scalar_lea.vmem (!%p115_p9), [#allocation2], %s485_s7 }
  0x10   : > { %s422_s16 = sshll.u32 (!%p115_p9), %s134_s14, 4  ;;  %s721_s22 = scalar_lea.hbm (!%p115_p9), %s760_s2, %s489_s8  ;;  %s423_s16 = int_to_ptr.vmem [resolvable:$true] %s422_s16 }
  0x11   : > { %s409_s23 = scalar_lea.sflag (!%p115_p9), [#allocation3], %s132_s6  ;;  %s550_s24 = scalar_lea.vmem (!%p115_p9), %s423_s16, 128 }
  0x12   : > { %p551_p11 = scmp.ne.s32.totalorder (!%p115_p9), %s423_s16, %s550_s24 }
  0x13   : > { %v143_v0 = vld [vmem:[%s759_s1 + $0x18] sm:$0xff]  ;;  %v612_v1 = vmov 0.0   ;;  %v142_v2 = vld [vmem:[%s759_s1 + $0x10] sm:$0xff]  ;;  %vm613_vm0 = vmmov 0   ;;  %s136_s25 = scalar_select %p135_p10, %s652_s13, 1  ;;  %v141_v3 = vld [vmem:[%s759_s1 + $0x8] sm:$0xff]  ;;  %v223_v6 = vlaneseq }
  0x14   : > { %497 = vmatprep.subr.mxu0 %v612_v1  ;;  %505 = vmatprep.mubr.msk.f32.mxu0 %vm613_vm0, %v612_v1  ;;  %v140_v4 = vld [vmem:[%s759_s1] sm:$0xff]  ;;  %vm144_vm1 = vcmask 261120   ;;  %v614_v10 = vmov 1966171168   ;;  %vm324_vm2 = vcmask 130048   ;;  %vm391_vm3 = vcmask 1041409   ;;  %p552_p12 = pnand %p551_p11, %p669_p5 }
  0x15   : > { %498 = vmatpush3.msra.mxu0 %v143_v0  ;;  %s486_s28 = sshll.u32 %s136_s25, 3  ;;  %v358_v7 = vand.u32 127, %v223_v6  ;;  %v224_v8 = vshrl.u32 %v223_v6, 7  ;;  %v221_v11 = vunpack.c.l.s4 %v614_v10  ;;  %vm393_vm4 = vcmask 1042434   ;;  %s615_s13 = smov [#allocation2]  }
  0x16   : > { %499 = vmatprep.subr.mxu0 %v612_v1  ;;  %s138_s5 = scalar_lea.vmem %s758_s0, %s486_s28  ;;  %vm395_vm5 = vcmask 1043459   ;;  %vm397_vm6 = vcmask 1044484   ;;  %vm399_vm7 = vcmask 1045509   ;;  %vm401_vm8 = vcmask 1046534   ;;  %p553_p13 = pneg %p552_p12 }
  0x17   : > { %500 = vmatpush3.msra.mxu0 %v142_v2  ;;  %v139_v5 = vld [vmem:[%s138_s5] sm:$0xff]  ;;  %v696_v9 = vsub.s32 %v358_v7, %v224_v8  ;;  %v222_v12 = vunpack.c.0.s8 %v221_v11  ;;  %v270_v16 = vsub.s32 0, %v224_v8  ;;  %vm403_vm9 = vcmask 1047559   ;;  %s554_s25 = sshll.u32 %s615_s13, 4  ;;  %s555_s25 = int_to_ptr.vmem [resolvable:$false] %s554_s25 }
  0x18   : > { %501 = vmatprep.subr.mxu0 %v612_v1  ;;  %vm406_vm10 = vcmask 64512   ;;  %s556_s26 = scalar_lea.vmem %s555_s25, 256  ;;  %p557_p0 = scmp.lt.s32.totalorder %s423_s16, %s555_s25 }
  0x19   : > { %502 = vmatpush3.msra.mxu0 %v141_v3  ;;  %v225_v13 = vsub.s32 %v222_v12, %v224_v8  ;;  %p558_p1 = scmp.lt.s32.totalorder %s556_s26, %s550_s24 }
  0x1a   : > { %503 = vmatprep.subr.mxu0 %v612_v1 }
  0x1b   : > { %504 = vmatpush3.msra.mxu0 %v140_v4  ;;  %p559_p2 = por %p558_p1, %p557_p0 }
  0x1c   : > { %506 = vmatmul.mubr.msk.f32.vlgmr.msra.gmra.mxu0 %vm144_vm1, %v139_v5 }
  0x1d   : > { %p560_p3 = pnand %p559_p2, %p553_p13 }
  0xdc   : > { %v214_v14 = vpop.f32.mrf.mxu0 }
  0xdd   : > { %v226_v15 = vrot.slane %v214_v14, %v225_v13  ;;  %v219_v17 = vcombine.high %v214_v14, %v214_v14 }
  0xde   : > { %v507_v18 = vpop.f32.mrf.mxu0 }
  0xdf   : > { %v242_v19 = vrot.slane %v226_v15, %v225_v13  ;;  %v234_v20 = vcombine.high %v226_v15, %v226_v15  ;;  %v233_v21 = vrot.slane %v219_v17, %v225_v13 }
  0xe1   : > { %v271_v22 = vrot.slane %v242_v19, %v270_v16  ;;  %v264_v23 = vcombine.high %v242_v19, %v242_v19  ;;  %v256_v24 = vrot.slane %v234_v20, %v225_v13  ;;  %v249_v25 = vrot.slane %v233_v21, %v225_v13 }
  0xe2   : > { %v235_v26 = vcombine.high %v233_v21, %v233_v21 }
  0xe3   : > { %v308_v27 = vsub.f32 %v271_v22, %v214_v14  ;;  %v279_v28 = vrot.slane %v264_v23, %v270_v16  ;;  %v275_v29 = vrot.slane %v256_v24, %v270_v16  ;;  %v266_v30 = vcombine.high %v256_v24, %v256_v24 }
  0xe4   : > { %v287_v31 = vrot.slane %v249_v25, %v270_v16  ;;  %v263_v32 = vrot.slane %v235_v26, %v225_v13  ;;  %v265_v33 = vcombine.high %v249_v25, %v249_v25 }
  0xe5   : > { %v316_v34 = vmul.f32 %v308_v27, %v308_v27  ;;  %v310_v35 = vsub.f32 %v279_v28, %v214_v14  ;;  %v309_v36 = vsub.f32 %v275_v29, %v214_v14  ;;  %v283_v37 = vrot.slane %v266_v30, %v270_v16 }
  0xe6   : > { %v312_v38 = vsub.f32 %v287_v31, %v214_v14  ;;  %v291_v39 = vrot.slane %v263_v32, %v270_v16  ;;  %v295_v40 = vrot.slane %v265_v33, %v270_v16  ;;  %v267_v41 = vcombine.high %v263_v32, %v263_v32 }
  0xe7   : > { %v325_v42 = vsel %vm324_vm2, %v316_v34, 0.0  ;;  %v318_v43 = vmul.f32 %v310_v35, %v310_v35  ;;  %v317_v44 = vmul.f32 %v309_v36, %v309_v36  ;;  %v311_v45 = vsub.f32 %v283_v37, %v214_v14 }
  0xe8   : > { %326 = vadd.xlane.f32.xlu0 %v325_v42  ;;  %v313_v48 = vsub.f32 %v291_v39, %v214_v14  ;;  %v299_v49 = vrot.slane %v267_v41, %v270_v16  ;;  %v320_v51 = vmul.f32 %v312_v38, %v312_v38  ;;  %v314_v52 = vsub.f32 %v295_v40, %v214_v14 }
  0xe9   : > { %v331_v46 = vsel %vm324_vm2, %v318_v43, 0.0  ;;  %v319_v47 = vmul.f32 %v311_v45, %v311_v45  ;;  %v328_v50 = vsel %vm324_vm2, %v317_v44, 0.0 }
  0xea   : > { %332 = vadd.xlane.f32.xlu1 %v331_v46  ;;  %v321_v54 = vmul.f32 %v313_v48, %v313_v48  ;;  %v315_v55 = vsub.f32 %v299_v49, %v214_v14  ;;  %v337_v56 = vsel %vm324_vm2, %v320_v51, 0.0  ;;  %v322_v57 = vmul.f32 %v314_v52, %v314_v52 }
  0xeb   : > { %v334_v53 = vsel %vm324_vm2, %v319_v47, 0.0 }
  0xec   : > { %329 = vadd.xlane.f32.xlu0 %v328_v50  ;;  %v340_v58 = vsel %vm324_vm2, %v321_v54, 0.0  ;;  %v323_v59 = vmul.f32 %v315_v55, %v315_v55  ;;  %v343_v60 = vsel %vm324_vm2, %v322_v57, 0.0 }
  0xee   : > { %335 = vadd.xlane.f32.xlu1 %v334_v53  ;;  %v346_v61 = vsel %vm324_vm2, %v323_v59, 0.0 }
  0xf0   : > { %338 = vadd.xlane.f32.xlu0 %v337_v56 }
  0xf2   : > { %341 = vadd.xlane.f32.xlu1 %v340_v58 }
  0xf4   : > { %344 = vadd.xlane.f32.xlu0 %v343_v60 }
  0xf6   : > { %347 = vadd.xlane.f32.xlu1 %v346_v61 }
 0x171   : > { %v327_v62 = vpop.xlane.xlu0 %326 }
 0x172   : > { %v362_v1 = vrot.slane %v327_v62, %v696_v9 }
 0x173   : > { %v333_v63 = vpop.xlane.xlu1 %332 }
 0x174   : > { %v370_v3 = vrot.slane %v333_v63, %v696_v9 }
 0x175   : > { %v330_v0 = vpop.xlane.xlu0 %329 }
 0x176   : > { %v366_v2 = vrot.slane %v330_v0, %v696_v9 }
 0x177   : > { %v336_v4 = vpop.xlane.xlu1 %335 }
 0x178   : > { %v392_v5 = vsel %vm391_vm3, %v366_v2, %v362_v1  ;;  %v374_v6 = vrot.slane %v336_v4, %v696_v9 }
 0x179   : > { %v394_v7 = vsel %vm393_vm4, %v370_v3, %v392_v5  ;;  %v339_v8 = vpop.xlane.xlu0 %338 }
 0x17a   : > { %v396_v10 = vsel %vm395_vm5, %v374_v6, %v394_v7  ;;  %v378_v11 = vrot.slane %v339_v8, %v696_v9 }
 0x17b   : > { %v342_v12 = vpop.xlane.xlu1 %341 }
 0x17c   : > { %v398_v13 = vsel %vm397_vm6, %v378_v11, %v396_v10  ;;  %v382_v14 = vrot.slane %v342_v12, %v696_v9 }
 0x17d   : > { %v345_v15 = vpop.xlane.xlu0 %344 }
 0x17e   : > { %v400_v16 = vsel %vm399_vm7, %v382_v14, %v398_v13  ;;  %v386_v17 = vrot.slane %v345_v15, %v696_v9 }
 0x17f   : > { %v348_v18 = vpop.xlane.xlu1 %347 }
 0x180   : > { %v402_v19 = vsel %vm401_vm8, %v386_v17, %v400_v16  ;;  %v390_v20 = vrot.slane %v348_v18, %v696_v9 }
 0x182   : > { %v404_v21 = vsel %vm403_vm9, %v390_v20, %v402_v19 }
 0x183   : > { %407 = vst.msk [vmem:[%s134_s14] sm:$0xff] %vm406_vm10, %v404_v21 }
 0x184   : > { %563 = shalt.err (!%p560_p3)
}
 0x185   : > { %s564_s27 = scalar_lea.hbm %s721_s22, 128  ;;  %s568_s30 = scalar_lea.hbm %s760_s2, 256 }
 0x186   : > { %p565_p4 = scmp.ne.s32.totalorder %s721_s22, %s564_s27  ;;  %p569_p9 = scmp.lt.s32.totalorder %s721_s22, %s760_s2 }
 0x187   : > { %p570_p10 = scmp.lt.s32.totalorder %s568_s30, %s564_s27 }
 0x188   : > { %p566_p7 = pnand %p565_p4, %p669_p5 }
 0x189   : > { %p571_p11 = por %p570_p10, %p569_p9 }
 0x18a   : > { %p567_p8 = pneg %p566_p7 }
 0x18c   : > { %p572_p12 = pnand %p571_p11, %p567_p8 }
 0x18e   : > { %575 = shalt.err (!%p572_p12)
}
 0x18f   : > { %508 = dma.vmem_to_hbm [thread:$0]  (%p669_p5), %s423_s16, 128, %s721_s22, %s409_s23  }
 0x190 PF: > { %p514_p13 = scmp.ge.s32.totalorder %s610_s12, 2  ;;  %s434_s5 = sand.u32 1, %s598_s9  }
 0x191   : > { %s435_s6 = scalar_lea.sflag [#allocation3], %s434_s5 }
 0x192   : > { %p511_p0 = pnand %p514_p13, %p673_p6 }
 0x194   : > { %p512_p1 = pneg %p511_p0 }
 0x196   : > { %593 = dma.done.wait (%p512_p1), %s435_s6, 128  }
 0x197   : > { %595 = vsyncadd (%p512_p1), %s435_s6, 4294967168  ;;  %p12_p2 = scmp.ge.s32.totalorder %s656_s15, 4   ;;  %s763_s9 = smov %s602_s10 }
 0x198   : > { %s764_s10 = smov %s606_s11  ;;  %s765_s11 = smov %s667_s18 }
 0x199   : > { %s766_s12 = smov %s656_s15  ;;  %14 = sbr.rel (!%p12_p2) target bundleno = 3 (0x3), region = 63 }
 0x19e   :  { %440 = vsyncpa [#allocation3], 1 }
 0x19f   :  { %442 = vsyncpa [#allocation3 + $0x1], 1 }

</bundles_post_ra>
